<compile_context>
chip_gen: v7x
topology: tpu7x:2x2x1
jax: 0.10.0
libtpu: 0.0.40
codegen_flags: <defaults>
</compile_context>

<pallas_src>
import functools

import jax
import jax.numpy as jnp
from jax import lax
from jax.experimental import pallas as pl
from jax.experimental.pallas import tpu as pltpu


def _cdiv(a, b):
    return (a + b - 1) // b


def _vmem_limit_bytes():
    """Generation-aware scoped-VMEM budget (~3/4 of physical, capped at 112 MiB)."""
    try:
        cap = int(pltpu.get_tpu_info().vmem_capacity_bytes)
    except Exception:
        cap = 64 * 1024 * 1024  # conservative fallback (v7x physical size)
    return min((cap * 3) // 4, 112 * 1024 * 1024)


def _divisor_tile(n, cap):
    """Largest tile <= cap that exactly divides n, preferring 128-aligned tiles."""
    if n <= cap:
        return n
    d = (cap // 128) * 128
    while d >= 128:
        if n % d == 0:
            return d
        d -= 128
    for d in range(min(cap, n), 0, -1):
        if n % d == 0:
            return d
    return n


# ----------------------------------------------------------------------------
# Tiled MXU matmul kernels (with / without bias, with / without K reduction loop)
# ----------------------------------------------------------------------------

def _mm_kernel(x_ref, w_ref, o_ref, acc_ref):
    @pl.when(pl.program_id(2) == 0)
    def _():
        acc_ref[...] = jnp.zeros_like(acc_ref)

    acc_ref[...] += jnp.dot(x_ref[...], w_ref[...],
                            preferred_element_type=jnp.float32)

    @pl.when(pl.program_id(2) == pl.num_programs(2) - 1)
    def _():
        o_ref[...] = acc_ref[...].astype(o_ref.dtype)


def _mm_bias_kernel(x_ref, w_ref, b_ref, o_ref, acc_ref):
    @pl.when(pl.program_id(2) == 0)
    def _():
        acc_ref[...] = jnp.zeros_like(acc_ref)

    acc_ref[...] += jnp.dot(x_ref[...], w_ref[...],
                            preferred_element_type=jnp.float32)

    @pl.when(pl.program_id(2) == pl.num_programs(2) - 1)
    def _():
        o_ref[...] = (acc_ref[...] + b_ref[...].astype(jnp.float32)).astype(o_ref.dtype)


def _mm_kernel_nok(x_ref, w_ref, o_ref):
    o_ref[...] = jnp.dot(x_ref[...], w_ref[...],
                         preferred_element_type=jnp.float32).astype(o_ref.dtype)


def _mm_bias_kernel_nok(x_ref, w_ref, b_ref, o_ref):
    acc = jnp.dot(x_ref[...], w_ref[...], preferred_element_type=jnp.float32)
    o_ref[...] = (acc + b_ref[...].astype(jnp.float32)).astype(o_ref.dtype)


def linear(x, w, b=None):
    """x: (M, K) @ w: (K, Nout) [+ b] -> (M, Nout), tiled for the MXU."""
    M, K = x.shape
    K2, Nout = w.shape
    assert K == K2
    tm = M if M <= 512 else 512
    tn = _divisor_tile(Nout, 1024)
    tk = _divisor_tile(K, 1024)          # exact divisor -> no garbage in the contraction
    nm, nn, nk = _cdiv(M, tm), Nout // tn, K // tk
    has_bias = b is not None
    args = (x, w) if not has_bias else (x, w, b.reshape(1, Nout))

    if nk == 1:  # full-K contraction: no reduction axis, no accumulator revisits
        grid = (nm, nn)
        in_specs = [pl.BlockSpec((tm, tk), lambda i, j: (i, 0)),
                    pl.BlockSpec((tk, tn), lambda i, j: (0, j))]
        if has_bias:
            in_specs.append(pl.BlockSpec((1, tn), lambda i, j: (0, j)))
        out_specs = pl.BlockSpec((tm, tn), lambda i, j: (i, j))
        kernel = _mm_bias_kernel_nok if has_bias else _mm_kernel_nok
        scratch = []
        dims = ("parallel", "parallel")
    else:
        grid = (nm, nn, nk)
        in_specs = [pl.BlockSpec((tm, tk), lambda i, j, k: (i, k)),
                    pl.BlockSpec((tk, tn), lambda i, j, k: (k, j))]
        if has_bias:
            in_specs.append(pl.BlockSpec((1, tn), lambda i, j, k: (0, j)))
        out_specs = pl.BlockSpec((tm, tn), lambda i, j, k: (i, j))
        kernel = _mm_bias_kernel if has_bias else _mm_kernel
        scratch = [pltpu.VMEM((tm, tn), jnp.float32)]
        dims = ("parallel", "parallel", "arbitrary")

    return pl.pallas_call(
        kernel,
        out_shape=jax.ShapeDtypeStruct((M, Nout), x.dtype),
        grid_spec=pltpu.PrefetchScalarGridSpec(
            num_scalar_prefetch=0, grid=grid,
            in_specs=in_specs, out_specs=out_specs, scratch_shapes=scratch),
        compiler_params=pltpu.CompilerParams(
            dimension_semantics=dims, vmem_limit_bytes=_vmem_limit_bytes()),
    )(*args)


def qkv_projection_split(x2d, w_qkv_t, B, N, C):
    """(B*N, C) @ (C, 3C) -> (3, B, N, C): q/k/v slabs split by the output BlockSpec
    (column tile j of the 3C axis lands at (j // nc, row, j % nc)) -- no extra HBM pass."""
    M, K = x2d.shape
    assert M == B * N and K == C and w_qkv_t.shape == (C, 3 * C)
    tm = M if M <= 512 else 512
    tn = _divisor_tile(C, 1024)   # must divide C so a column tile never straddles q/k/v
    tk = _divisor_tile(K, 1024)
    nc = C // tn                  # column tiles per q/k/v slab
    nm, nn, nk = _cdiv(M, tm), 3 * nc, K // tk

    if nk == 1:
        grid = (nm, nn)
        in_specs = [pl.BlockSpec((tm, tk), lambda i, j: (i, 0)),
                    pl.BlockSpec((tk, tn), lambda i, j: (0, j))]
        out_specs = pl.BlockSpec((None, tm, tn), lambda i, j: (j // nc, i, j % nc))
        kernel = _mm_kernel_nok
        scratch = []
        dims = ("parallel", "parallel")
    else:
        grid = (nm, nn, nk)
        in_specs = [pl.BlockSpec((tm, tk), lambda i, j, k: (i, k)),
                    pl.BlockSpec((tk, tn), lambda i, j, k: (k, j))]
        out_specs = pl.BlockSpec((None, tm, tn), lambda i, j, k: (j // nc, i, j % nc))
        kernel = _mm_kernel
        scratch = [pltpu.VMEM((tm, tn), jnp.float32)]
        dims = ("parallel", "parallel", "arbitrary")

    qkv3 = pl.pallas_call(
        kernel,
        out_shape=jax.ShapeDtypeStruct((3, M, C), x2d.dtype),
        grid_spec=pltpu.PrefetchScalarGridSpec(
            num_scalar_prefetch=0, grid=grid,
            in_specs=in_specs, out_specs=out_specs, scratch_shapes=scratch),
        compiler_params=pltpu.CompilerParams(
            dimension_semantics=dims, vmem_limit_bytes=_vmem_limit_bytes()),
    )(x2d, w_qkv_t)
    return qkv3.reshape(3, B, N, C)


# ----------------------------------------------------------------------------
# Fused attention core: all heads of a q tile per grid step, online softmax
# ----------------------------------------------------------------------------

def _mha_kernel(q_ref, k_ref, v_ref, o_ref, m_sc, l_sc, acc_sc, *,
                scale, num_heads, head_dim, seq_len, block_kv, mask_kv):
    kv_idx = pl.program_id(2)
    H, D = num_heads, head_dim

    @pl.when(kv_idx == 0)
    def _():
        m_sc[...] = jnp.full_like(m_sc, -jnp.inf)
        l_sc[...] = jnp.zeros_like(l_sc)
        acc_sc[...] = jnp.zeros_like(acc_sc)

    if mask_kv:
        # Ragged kv tail: mask padded key columns and zero padded value rows so the
        # (undefined) padded data can never contaminate valid rows.
        limit = seq_len - kv_idx * block_kv
        col_valid = lax.broadcasted_iota(jnp.int32, (1, block_kv), 1) < limit
        row_valid = lax.broadcasted_iota(jnp.int32, (block_kv, 1), 0) < limit

    for h in range(H):
        lo, hi = h * D, (h + 1) * D
        qh = q_ref[:, lo:hi] * scale          # (tq, D), native dtype (bf16 stays bf16)
        kh = k_ref[:, lo:hi]                  # (tkv, D)
        vh = v_ref[:, lo:hi]                  # (tkv, D)
        if mask_kv:
            vh = jnp.where(row_valid, vh, jnp.zeros_like(vh))

        s = lax.dot_general(qh, kh, (((1,), (1,)), ((), ())),
                            preferred_element_type=jnp.float32)   # (tq, tkv)
        if mask_kv:
            s = jnp.where(col_valid, s, -1e30)

        m_prev = m_sc[h]                                          # (tq, 1) f32
        m_new = jnp.maximum(m_prev, s.max(axis=-1, keepdims=True))
        alpha = jnp.exp(m_prev - m_new)
        p = jnp.exp(s - m_new)
        l_sc[h] = alpha * l_sc[h] + p.sum(axis=-1, keepdims=True)
        acc_sc[h] = alpha * acc_sc[h] + jnp.dot(
            p.astype(vh.dtype), vh, preferred_element_type=jnp.float32)
        m_sc[h] = m_new

    @pl.when(kv_idx == pl.num_programs(2) - 1)
    def _():
        for h in range(H):
            inv = pl.reciprocal(l_sc[h], approx=True)             # EUP slot
            o_ref[:, h * D:(h + 1) * D] = (acc_sc[h] * inv).astype(o_ref.dtype)


def mha(qkv3, out_dtype, *, num_heads, scale):
    """qkv3: (3, B, N, C) with q/k/v slabs along axis 0 -> (B, N, C) attention output."""
    _, B, N, C = qkv3.shape
    H = num_heads
    D = C // H
    tq = N if N <= 128 else 128          # keep >=2 q blocks for real ViT N (v7x 2 TCs)
    tkv = N if N <= 512 else 512         # score tiles stay near vreg capacity
    n_q, n_kv = _cdiv(N, tq), _cdiv(N, tkv)
    mask_kv = (N % tkv) != 0

    kernel = functools.partial(
        _mha_kernel, scale=scale, num_heads=H, head_dim=D,
        seq_len=N, block_kv=tkv, mask_kv=mask_kv)

    # TODO(synk): pipeline_mode=pl.Buffered(3) on the k/v specs would further hide
    # k/v DMA on bandwidth-poor v5e; omitted for broad lowering compatibility.
    return pl.pallas_call(
        kernel,
        out_shape=jax.ShapeDtypeStruct((B, N, C), out_dtype),
        grid_spec=pltpu.PrefetchScalarGridSpec(
            num_scalar_prefetch=0,
            grid=(B, n_q, n_kv),
            in_specs=[
                pl.BlockSpec((None, None, tq, C), lambda b, i, j: (0, b, i, 0)),
                pl.BlockSpec((None, None, tkv, C), lambda b, i, j: (1, b, j, 0)),
                pl.BlockSpec((None, None, tkv, C), lambda b, i, j: (2, b, j, 0)),
            ],
            out_specs=pl.BlockSpec((None, tq, C), lambda b, i, j: (b, i, 0)),
            scratch_shapes=[
                pltpu.VMEM((H, tq, 1), jnp.float32),   # running max m, per head
                pltpu.VMEM((H, tq, 1), jnp.float32),   # running denom l, per head
                pltpu.VMEM((H, tq, D), jnp.float32),   # output accumulator, per head
            ],
        ),
        compiler_params=pltpu.CompilerParams(
            dimension_semantics=("parallel", "parallel", "arbitrary"),
            vmem_limit_bytes=_vmem_limit_bytes(),
        ),
    )(qkv3, qkv3, qkv3)


# ----------------------------------------------------------------------------
# Full Attention forward (matches the PyTorch module)
# ----------------------------------------------------------------------------

def attention_forward(x, w_qkv_t, w_proj_t, b_proj, *, num_heads, scale=None):
    """x: (B, N, C); w_qkv_t: (C, 3C); w_proj_t: (C, C); b_proj: (C,)."""
    B, N, C = x.shape
    H = num_heads
    assert C % H == 0
    D = C // H
    if scale is None:
        scale = D ** (-0.5)

    x2d = x.reshape(B * N, C)

    if C % 128 == 0:
        # Fast path: qkv matmul writes q/k/v slabs directly (no transposes anywhere).
        qkv3 = qkv_projection_split(x2d, w_qkv_t, B, N, C)        # (3, B, N, C)
    else:
        # Lane-unaligned C (tiny / odd dims): plain matmul + one cheap relayout.
        qkv = linear(x2d, w_qkv_t)                                # (B*N, 3C), no bias
        qkv3 = qkv.reshape(B, N, 3, C).transpose(2, 0, 1, 3)      # (3, B, N, C)

    o = mha(qkv3, x.dtype, num_heads=H, scale=scale)              # (B, N, C), head-major
    out = linear(o.reshape(B * N, C), w_proj_t, b_proj)           # (B*N, C)
    # TODO(synk): attn_drop / proj_drop not implemented; module defaults p=0.0 -> identity.
    return out.reshape(B, N, C)


def attention_reference(x, w_qkv_t, w_proj_t, b_proj, *, num_heads, scale=None):
    B, N, C = x.shape
    H = num_heads
    D = C // H
    if scale is None:
        scale = D ** (-0.5)
    qkv = jnp.einsum("bnc,cd->bnd", x, w_qkv_t)
    qkv = qkv.reshape(B, N, 3, H, D).transpose(2, 0, 3, 1, 4)
    q, k, v = qkv[0], qkv[1], qkv[2]                              # (B, H, N, D)
    attn = jnp.einsum("bhqd,bhkd->bhqk", q, k) * scale
    attn = jax.nn.softmax(attn, axis=-1)
    out = jnp.einsum("bhqk,bhkd->bhqd", attn, v)
    out = out.transpose(0, 2, 1, 3).reshape(B, N, C)
    return out @ w_proj_t + b_proj


if __name__ == "__main__":

    def _run_case(batch, seq, dim, num_heads, key):
        k_x, k_qkv, k_pw, k_pb = jax.random.split(key, 4)
        x = jax.random.normal(k_x, (batch, seq, dim), dtype=jnp.float32)
        # Weights stored pre-transposed (in_features, out_features), ~nn.Linear scale.
        w_qkv_t = jax.random.normal(k_qkv, (dim, 3 * dim), dtype=jnp.float32) * (dim ** -0.5)
        w_proj_t = jax.random.normal(k_pw, (dim, dim), dtype=jnp.float32) * (dim ** -0.5)
        b_proj = jax.random.normal(k_pb, (dim,), dtype=jnp.float32) * 0.02

        out = attention_forward(x, w_qkv_t, w_proj_t, b_proj, num_heads=num_heads)
        out = jax.block_until_ready(out)
        ref = attention_reference(x, w_qkv_t, w_proj_t, b_proj, num_heads=num_heads)
        assert out.shape == x.shape and out.dtype == x.dtype
        max_err = float(jnp.max(jnp.abs(out - ref)))
        assert jnp.allclose(out, ref, atol=2e-2, rtol=2e-2), max_err

    key = jax.random.PRNGKey(0)
    k1, k2 = jax.random.split(key)
    # Tiny config (C not lane-aligned -> generic qkv path, single kv block).
    _run_case(batch=2, seq=8, dim=32, num_heads=8, key=k1)
    # ViT-like config (C % 128 == 0 -> fused qkv split, ragged q tiles, masked kv tail).
    _run_case(batch=2, seq=600, dim=256, num_heads=4, key=k2)

    print("KERNEL_OK")
</pallas_src>

<mosaic_0001>
module attributes {stable_mosaic.version = 11 : i64} {
  func.func @_mm_kernel_nok(%arg0: i32, %arg1: i32, %arg2: memref<16x32xf32, #tpu.memory_space<vmem>>, %arg3: memref<32x96xf32, #tpu.memory_space<vmem>>, %arg4: memref<16x96xf32, #tpu.memory_space<vmem>>) attributes {dimension_semantics = [#tpu.dimension_semantics<parallel>, #tpu.dimension_semantics<parallel>], iteration_bounds = array<i64: 1, 1>, scalar_prefetch = 0 : i64, scratch_operands = 0 : i64, tpu.core_type = #tpu.core_type<tc>, window_params = [{transform_indices = @transform_0, window_bounds = array<i64: 16, 32>}, {transform_indices = @transform_1, window_bounds = array<i64: 32, 96>}, {transform_indices = @transform_2, window_bounds = array<i64: 16, 96>}]} {
    %c0 = arith.constant 0 : index
    %c0_0 = arith.constant 0 : index
    %0 = vector.load %arg2[%c0, %c0_0] : memref<16x32xf32, #tpu.memory_space<vmem>>, vector<16x32xf32>
    %c0_1 = arith.constant 0 : index
    %c0_2 = arith.constant 0 : index
    %1 = vector.load %arg3[%c0_1, %c0_2] : memref<32x96xf32, #tpu.memory_space<vmem>>, vector<32x96xf32>
    %cst = arith.constant dense<0.000000e+00> : vector<16x96xf32>
    %2 = tpu.matmul %0, %1, %cst {dimension_numbers = #tpu.dot_dimension_numbers<[1], [0], [0], [1], [0, 0, 1, 1], [], []>} : vector<16x32xf32>, vector<32x96xf32>, vector<16x96xf32> -> vector<16x96xf32>
    %c0_3 = arith.constant 0 : index
    %c0_4 = arith.constant 0 : index
    %3 = vector.load %arg4[%c0_3, %c0_4] : memref<16x96xf32, #tpu.memory_space<vmem>>, vector<16x96xf32>
    tpu.vector_store %arg4[%c0_3, %c0_4], %2 {strides = array<i32>} : memref<16x96xf32, #tpu.memory_space<vmem>>, vector<16x96xf32>,
    return
  }
  func.func @transform_0(%arg0: i32, %arg1: i32) -> (i32, i32) {
    %c0_i32 = arith.constant 0 : i32
    %c0_i32_0 = arith.constant 0 : i32
    return %arg0, %c0_i32 : i32, i32
  }
  func.func @transform_1(%arg0: i32, %arg1: i32) -> (i32, i32) {
    %c0_i32 = arith.constant 0 : i32
    %c0_i32_0 = arith.constant 0 : i32
    return %c0_i32, %arg1 : i32, i32
  }
  func.func @transform_2(%arg0: i32, %arg1: i32) -> (i32, i32) {
    %c0_i32 = arith.constant 0 : i32
    return %arg0, %arg1 : i32, i32
  }
}

</mosaic_0001>

<bundles_post_ra>
// kernel: tpu_custom_call.1
= control target key start
LH: loop header
LB: loop body
LE: loop exit
PB: predicated region body
PF: predicated region fallthrough
CT: control target
= control target key end

     0   :  { %7 = vsyncpa [#allocation3], 0  ;;  %s318_s0 = inlined_call_operand.hbm [shape: f32[16,32], index: 0, kind: input, shape index: {}]   ;;  %s319_s1 = inlined_call_operand.hbm [shape: f32[32,96], index: 1, kind: input, shape index: {}]   ;;  %s320_s2 = inlined_call_operand.hbm [shape: f32[16,96], index: 2, kind: output, shape index: {}]  }
   0x1   :  { %8 = vsyncpa [#allocation6], 0 }
   0x2   :  { %9 = vsyncpa [#allocation4], 0  ;;  %s253_s9 = smov [#allocation2]   ;;  %s181_s13 = scalar_lea.hbm %s318_s0, 256 }
   0x3   :  { %s15_s10 = sshll.u32 %s253_s9, 4  ;;  %p182_p0 = scmp.ne.s32.totalorder %s318_s0, %s181_s13  ;;  %s16_s10 = int_to_ptr.vmem [resolvable:$true] %s15_s10 }
   0x4   :  { %p185_p1 = scmp.lt.u32.totalorder %s181_s13, %s318_s0 }
   0x6   :  { %p187_p2 = pnand %p185_p1, %p182_p0 }
   0x8   :  { %190 = shalt.err (!%p187_p2)
}
   0x9   :  { %s191_s18 = scalar_lea.vmem %s16_s10, 256  ;;  %p196_p4 = scmp.lt.s32.totalorder %s16_s10, %s16_s10 }
   0xa   :  { %p192_p3 = scmp.ne.s32.totalorder %s16_s10, %s191_s18  ;;  %p197_p5 = scmp.lt.s32.totalorder %s191_s18, %s191_s18 }
   0xc   :  { %p198_p6 = por %p197_p5, %p196_p4 }
   0xe   :  { %p199_p7 = pnand %p198_p6, %p192_p3 }
  0x10   :  { %202 = shalt.err (!%p199_p7)
}
  0x11   :  { %s254_s19 = smov 128   ;;  %s255_s20 = smov 8  }
  0x12   :  { %21 = dma.hbm_to_vmem [thread:$0]  %s318_s0, 256, %s16_s10, [#allocation3], %s254_s19, %s254_s19, %s255_s20  }
  0x13   :  { %s256_s23 = smov [#allocation5]   ;;  %s203_s27 = scalar_lea.hbm %s319_s1, 512 }
  0x14   :  { %s27_s24 = sshll.u32 %s256_s23, 4  ;;  %p204_p8 = scmp.ne.s32.totalorder %s319_s1, %s203_s27  ;;  %s28_s24 = int_to_ptr.vmem [resolvable:$true] %s27_s24 }
  0x15   :  { %p207_p9 = scmp.lt.u32.totalorder %s203_s27, %s319_s1 }
  0x17   :  { %p209_p10 = pnand %p207_p9, %p204_p8 }
  0x19   :  { %212 = shalt.err (!%p209_p10)
}
  0x1a   :  { %s213_s4 = scalar_lea.vmem %s28_s24, 512  ;;  %p218_p12 = scmp.lt.s32.totalorder %s28_s24, %s28_s24 }
  0x1b   :  { %p214_p11 = scmp.ne.s32.totalorder %s28_s24, %s213_s4  ;;  %p219_p13 = scmp.lt.s32.totalorder %s213_s4, %s213_s4 }
  0x1d   :  { %p220_p0 = por %p219_p13, %p218_p12 }
  0x1f   :  { %p221_p1 = pnand %p220_p0, %p214_p11 }
  0x21   :  { %224 = shalt.err (!%p221_p1)
}
  0x22   :  { %33 = dma.hbm_to_vmem [thread:$0]  %s319_s1, 512, %s28_s24, [#allocation6], %s254_s19, %s254_s19, %s255_s20  }
  0x23   :  { %247 = dma.done.wait [#allocation3], 256  }
  0x24   :  { %248 = vsyncadd [#allocation3], 4294967040 }
  0x25   :  { %249 = dma.done.wait [#allocation6], 512  }
  0x26   :  { %250 = vsyncadd [#allocation6], 4294966784  ;;  %vm46_vm0 = vcmask 261120   ;;  %v42_v0 = vld [vmem:[#allocation5] sm:$0xff]  ;;  %v43_v1 = vld [vmem:[#allocation5 + $0x8] sm:$0xff]  ;;  %s257_s1 = smov [#allocation7]  }
  0x27   :  { %v44_v2 = vld [vmem:[#allocation5 + $0x10] sm:$0xff]  ;;  %v168_v3 = vpack.c.bf16 %v43_v1, %v42_v0  ;;  %v45_v4 = vld [vmem:[#allocation5 + $0x18] sm:$0xff]  ;;  %s136_s6 = sshll.u32 %s257_s1, 4  ;;  %vm128_vm1 = vcmask 785408   ;;  %s137_s6 = int_to_ptr.vmem [resolvable:$true] %s136_s6 }
  0x28   :  { %v40_v5 = vld [vmem:[#allocation2] sm:$0xff]  ;;  %v172_v6 = vpack.c.bf16 %v45_v4, %v44_v2  ;;  %v41_v7 = vld [vmem:[#allocation2 + $0x8] sm:$0xff]  ;;  %s225_s7 = scalar_lea.vmem %s137_s6, 256  ;;  %p230_p3 = scmp.lt.s32.totalorder %s137_s6, %s137_s6 }
  0x29   :  { %165 = vmatprep.mubr.msk.f32.mxu0 %vm46_vm0, %v40_v5  ;;  %169 = vmatprep.subr.bf16.mxu0 %v168_v3  ;;  %p226_p2 = scmp.ne.s32.totalorder %s137_s6, %s225_s7  ;;  %p231_p4 = scmp.lt.s32.totalorder %s225_s7, %s225_s7 }
  0x2a   :  { %171 = vmatpush3.bf16.msra.mxu0 %v168_v3 }
  0x2b   :  { %173 = vmatprep.subr.bf16.mxu0 %v172_v6  ;;  %p232_p5 = por %p231_p4, %p230_p3 }
  0x2d   :  { %p233_p6 = pnand %p232_p5, %p226_p2 }
  0x2e   :  { %175 = vmatpush3.bf16.msra.mxu0 %v172_v6 }
  0x31   :  { %166 = vmatmul.mubr.msk.f32.vlgmr.msra.gmra.mrb[0].mxu0 %vm46_vm0, %v41_v7 }
 0x104   :  { %v167_v8 = vpop.f32.mrb[0].mxu0 }
 0x105   :  { %130 = vst.msk [vmem:[#allocation7 + $0x8] sm:$0xff] %vm128_vm1, %v167_v8  ;;  %v119_v9 = vpop.f32.mrb[1].mxu0 }
 0x106   :  { %129 = vst.msk [vmem:[#allocation7] sm:$0xff] %vm128_vm1, %v119_v9 }
 0x107   :  { %236 = shalt.err (!%p233_p6)
}
 0x108   :  { %s237_s10 = scalar_lea.hbm %s320_s2, 256 }
 0x109   :  { %p238_p7 = scmp.ne.s32.totalorder %s320_s2, %s237_s10  ;;  %p241_p8 = scmp.lt.u32.totalorder %s237_s10, %s320_s2 }
 0x10b   :  { %p243_p9 = pnand %p241_p8, %p238_p7 }
 0x10d   :  { %246 = shalt.err (!%p243_p9)
}
 0x10e   :  { %142 = dma.vmem_to_hbm [thread:$0]  %s137_s6, 256, %s320_s2, [#allocation4], %s254_s19, %s254_s19, %s255_s20  }
 0x10f   :  { %251 = dma.done.wait [#allocation4], 256  }
 0x110   :  { %252 = vsyncadd [#allocation4], 4294967040 }
 0x111   :  { %146 = vsyncpa [#allocation3], 1 }
 0x112   :  { %147 = vsyncpa [#allocation6], 1 }
 0x113   :  { %148 = vsyncpa [#allocation4], 1 }

</bundles_post_ra>
